<compile_context>
chip_gen: v7x
topology: tpu7x:2x2x1
jax: 0.10.0
libtpu: 0.0.40
codegen_flags: <defaults>
</compile_context>

<pallas_src>
import functools

import jax
import jax.numpy as jnp
from jax.experimental import pallas as pl
from jax.experimental.pallas import tpu as pltpu

LANE = 128


def _grad_force_kernel(wsym_ref, pos_ref, force_ref):
    # wsym_ref:  (9,)      SMEM f32, row-major flattening of the 3x3 Wsym
    # pos_ref:   (3, T)    VMEM f32, rows = x/y/z coords of T flattened atoms
    # force_ref: (3, T)    VMEM f32
    p0 = pos_ref[0:1, :]                                   # (1, T)
    p1 = pos_ref[1:2, :]
    p2 = pos_ref[2:3, :]
    # force_j = -( p0*W[0,j] + p1*W[1,j] + p2*W[2,j] )  == -(pos @ Wsym)[:, j]
    for j in range(3):
        force_ref[j:j + 1, :] = -(p0 * wsym_ref[0 + j]
                                  + p1 * wsym_ref[3 + j]
                                  + p2 * wsym_ref[6 + j])


@functools.partial(jax.jit, static_argnames=("tile_m",))
def gradient_force_output(pos, wsym, tile_m=2048):
    """force = -(dE/dpos) for the quadratic energy defined by wsym.

    pos:  [B, N, 3] float32
    wsym: [3, 3]    float32 (already symmetrized)
    returns force: [B, N, 3] float32
    """
    B, N, D = pos.shape
    M = B * N

    # Lane-dense layout: xyz on the sublane axis, flattened atoms on lanes.
    pos_t = pos.reshape(M, D).T                            # [3, M]

    # Choose a lane tile (multiple of 128), pad the atom axis to a tile multiple.
    tile = min(tile_m, pl.cdiv(M, LANE) * LANE)
    m_pad = pl.cdiv(M, tile) * tile
    if m_pad != M:
        pos_t = jnp.pad(pos_t, ((0, 0), (0, m_pad - M)))   # [3, Mpad]

    wsym_flat = wsym.reshape(-1).astype(jnp.float32)       # (9,) -> SMEM

    force_t = pl.pallas_call(
        _grad_force_kernel,
        out_shape=jax.ShapeDtypeStruct((D, m_pad), pos.dtype),
        grid_spec=pltpu.PrefetchScalarGridSpec(
            num_scalar_prefetch=0,
            grid=(m_pad // tile,),
            in_specs=[
                # Grid-invariant 3x3 weights as SMEM scalars (fetched once).
                pl.BlockSpec(memory_space=pltpu.MemorySpace.SMEM),
                # Lane-dense atom tiles.
                pl.BlockSpec((D, tile), lambda i: (0, i)),
            ],
            out_specs=pl.BlockSpec((D, tile), lambda i: (0, i)),
        ),
        compiler_params=pltpu.CompilerParams(
            dimension_semantics=("parallel",),
            vmem_limit_bytes=32 * 1024 * 1024,
        ),
    )(wsym_flat, pos_t)

    # Undo the layout transform: [3, Mpad] -> [B, N, 3].
    return force_t[:, :M].T.reshape(B, N, D)


# ---------------------------------------------------------------- reference ---
def energy_fn(pos, displacement, W, C):
    # E_b = 0.5 * sum_i pos_i^T W pos_i + <C, displacement_b>
    quad = 0.5 * jnp.einsum("bni,ij,bnj->b", pos, W, pos)
    lin = jnp.einsum("ij,bij->b", C, displacement)
    return quad + lin


def reference_force(pos, displacement, W, C):
    # Mirrors DerivativeProperty._save_grad: grad of energy w.r.t. pos with
    # grad_outputs = ones_like(energy)   (i.e. grad of sum(energy)).
    pos_grad = jax.grad(lambda p: energy_fn(p, displacement, W, C).sum())(pos)
    return -pos_grad
    # TODO(synk): displacement_grad is also stored on `outputs` by _save_grad but
    # is not returned by GradientForceOutput.forward, so it is not computed here.


if __name__ == "__main__":
    key = jax.random.PRNGKey(0)
    k_pos, k_disp, k_w, k_c = jax.random.split(key, 4)

    B, N, D = 2, 8, 3
    pos = jax.random.normal(k_pos, (B, N, D), dtype=jnp.float32)
    displacement = jax.random.normal(k_disp, (B, D, D), dtype=jnp.float32)

    # Deterministic synthetic "model" parameters defining the energy surface.
    W = jax.random.normal(k_w, (D, D), dtype=jnp.float32)
    C = jax.random.normal(k_c, (D, D), dtype=jnp.float32)
    Wsym = 0.5 * (W + W.T)

    force = gradient_force_output(pos, Wsym)
    force = jax.block_until_ready(force)

    force_ref = reference_force(pos, displacement, W, C)
    assert force.shape == (B, N, D)
    assert jnp.allclose(force, force_ref, atol=1e-5, rtol=1e-5), (
        "Pallas force does not match jax.grad reference")

    print("KERNEL_OK")
</pallas_src>

<mosaic_0001>
module attributes {stable_mosaic.version = 11 : i64} {
  func.func @_grad_force_kernel(%arg0: i32, %arg1: memref<9xf32, #tpu.memory_space<smem>>, %arg2: memref<3x128xf32, #tpu.memory_space<vmem>>, %arg3: memref<3x128xf32, #tpu.memory_space<vmem>>) attributes {dimension_semantics = [#tpu.dimension_semantics<parallel>], iteration_bounds = array<i64: 1>, scalar_prefetch = 0 : i64, scratch_operands = 0 : i64, tpu.core_type = #tpu.core_type<tc>, window_params = [{transform_indices = @transform_0, window_bounds = array<i64: 9>}, {transform_indices = @transform_1, window_bounds = array<i64: 3, 128>}, {transform_indices = @transform_2, window_bounds = array<i64: 3, 128>}]} {
    %c0 = arith.constant 0 : index
    %c0_0 = arith.constant 0 : index
    %0 = vector.load %arg2[%c0, %c0_0] : memref<3x128xf32, #tpu.memory_space<vmem>>, vector<1x128xf32>
    %c1 = arith.constant 1 : index
    %c0_1 = arith.constant 0 : index
    %1 = vector.load %arg2[%c1, %c0_1] : memref<3x128xf32, #tpu.memory_space<vmem>>, vector<1x128xf32>
    %c2 = arith.constant 2 : index
    %c0_2 = arith.constant 0 : index
    %2 = vector.load %arg2[%c2, %c0_2] : memref<3x128xf32, #tpu.memory_space<vmem>>, vector<1x128xf32>
    %c0_3 = arith.constant 0 : index
    %3 = memref.load %arg1[%c0_3] : memref<9xf32, #tpu.memory_space<smem>>
    %4 = vector.broadcast %3 : f32 to vector<1x128xf32>
    %5 = arith.mulf %0, %4 : vector<1x128xf32>
    %c3 = arith.constant 3 : index
    %6 = memref.load %arg1[%c3] : memref<9xf32, #tpu.memory_space<smem>>
    %7 = vector.broadcast %6 : f32 to vector<1x128xf32>
    %8 = arith.mulf %1, %7 : vector<1x128xf32>
    %9 = arith.addf %5, %8 : vector<1x128xf32>
    %c6 = arith.constant 6 : index
    %10 = memref.load %arg1[%c6] : memref<9xf32, #tpu.memory_space<smem>>
    %11 = vector.broadcast %10 : f32 to vector<1x128xf32>
    %12 = arith.mulf %2, %11 : vector<1x128xf32>
    %13 = arith.addf %9, %12 : vector<1x128xf32>
    %cst = arith.constant 0.000000e+00 : f32
    %14 = vector.broadcast %cst : f32 to vector<1x128xf32>
    %15 = arith.subf %14, %13 : vector<1x128xf32>
    %c0_4 = arith.constant 0 : index
    %c0_5 = arith.constant 0 : index
    %16 = vector.load %arg3[%c0_4, %c0_5] : memref<3x128xf32, #tpu.memory_space<vmem>>, vector<1x128xf32>
    tpu.vector_store %arg3[%c0_4, %c0_5], %15 {strides = array<i32>} : memref<3x128xf32, #tpu.memory_space<vmem>>, vector<1x128xf32>,
    %c1_6 = arith.constant 1 : index
    %17 = memref.load %arg1[%c1_6] : memref<9xf32, #tpu.memory_space<smem>>
    %18 = vector.broadcast %17 : f32 to vector<1x128xf32>
    %19 = arith.mulf %0, %18 : vector<1x128xf32>
    %c4 = arith.constant 4 : index
    %20 = memref.load %arg1[%c4] : memref<9xf32, #tpu.memory_space<smem>>
    %21 = vector.broadcast %20 : f32 to vector<1x128xf32>
    %22 = arith.mulf %1, %21 : vector<1x128xf32>
    %23 = arith.addf %19, %22 : vector<1x128xf32>
    %c7 = arith.constant 7 : index
    %24 = memref.load %arg1[%c7] : memref<9xf32, #tpu.memory_space<smem>>
    %25 = vector.broadcast %24 : f32 to vector<1x128xf32>
    %26 = arith.mulf %2, %25 : vector<1x128xf32>
    %27 = arith.addf %23, %26 : vector<1x128xf32>
    %cst_7 = arith.constant 0.000000e+00 : f32
    %28 = vector.broadcast %cst_7 : f32 to vector<1x128xf32>
    %29 = arith.subf %28, %27 : vector<1x128xf32>
    %c1_8 = arith.constant 1 : index
    %c0_9 = arith.constant 0 : index
    %30 = vector.load %arg3[%c1_8, %c0_9] : memref<3x128xf32, #tpu.memory_space<vmem>>, vector<1x128xf32>
    tpu.vector_store %arg3[%c1_8, %c0_9], %29 {strides = array<i32>} : memref<3x128xf32, #tpu.memory_space<vmem>>, vector<1x128xf32>,
    %c2_10 = arith.constant 2 : index
    %31 = memref.load %arg1[%c2_10] : memref<9xf32, #tpu.memory_space<smem>>
    %32 = vector.broadcast %31 : f32 to vector<1x128xf32>
    %33 = arith.mulf %0, %32 : vector<1x128xf32>
    %c5 = arith.constant 5 : index
    %34 = memref.load %arg1[%c5] : memref<9xf32, #tpu.memory_space<smem>>
    %35 = vector.broadcast %34 : f32 to vector<1x128xf32>
    %36 = arith.mulf %1, %35 : vector<1x128xf32>
    %37 = arith.addf %33, %36 : vector<1x128xf32>
    %c8 = arith.constant 8 : index
    %38 = memref.load %arg1[%c8] : memref<9xf32, #tpu.memory_space<smem>>
    %39 = vector.broadcast %38 : f32 to vector<1x128xf32>
    %40 = arith.mulf %2, %39 : vector<1x128xf32>
    %41 = arith.addf %37, %40 : vector<1x128xf32>
    %cst_11 = arith.constant 0.000000e+00 : f32
    %42 = vector.broadcast %cst_11 : f32 to vector<1x128xf32>
    %43 = arith.subf %42, %41 : vector<1x128xf32>
    %c2_12 = arith.constant 2 : index
    %c0_13 = arith.constant 0 : index
    %44 = vector.load %arg3[%c2_12, %c0_13] : memref<3x128xf32, #tpu.memory_space<vmem>>, vector<1x128xf32>
    tpu.vector_store %arg3[%c2_12, %c0_13], %43 {strides = array<i32>} : memref<3x128xf32, #tpu.memory_space<vmem>>, vector<1x128xf32>,
    return
  }
  func.func @transform_0(%arg0: i32) -> i32 {
    %c0_i32 = arith.constant 0 : i32
    %c0_i32_0 = arith.constant 0 : i32
    return %c0_i32 : i32
  }
  func.func @transform_1(%arg0: i32) -> (i32, i32) {
    %c0_i32 = arith.constant 0 : i32
    %c0_i32_0 = arith.constant 0 : i32
    return %c0_i32, %arg0 : i32, i32
  }
  func.func @transform_2(%arg0: i32) -> (i32, i32) {
    %c0_i32 = arith.constant 0 : i32
    %c0_i32_0 = arith.constant 0 : i32
    return %c0_i32, %arg0 : i32, i32
  }
}

</mosaic_0001>

<bundles_post_ra>
// kernel: gradient_force_output.1
= control target key start
LH: loop header
LB: loop body
LE: loop exit
PB: predicated region body
PF: predicated region fallthrough
CT: control target
= control target key end

     0   :  { %7 = vsyncpa [#allocation3], 0  ;;  %s131_s0 = inlined_call_operand.vmem [shape: f32[9], index: 0, kind: input, shape index: {}]   ;;  %s132_s1 = inlined_call_operand.vmem [shape: f32[3,128], index: 1, kind: input, shape index: {}]   ;;  %s133_s2 = inlined_call_operand.vmem [shape: f32[3,128], index: 2, kind: output, shape index: {}]  }
   0x1   :  { %s14_s11 = sshll.u32 %s131_s0, 4  ;;  %s15_s11 = int_to_ptr.vmem [resolvable:$true] %s14_s11 }
   0x2   :  { %s80_s12 = scalar_lea.vmem %s15_s11, 16  ;;  %p85_p1 = scmp.lt.s32.totalorder %s15_s11, %s15_s11 }
   0x3   :  { %p81_p0 = scmp.ne.s32.totalorder %s15_s11, %s80_s12  ;;  %p86_p2 = scmp.lt.s32.totalorder %s80_s12, %s80_s12 }
   0x5   :  { %p87_p3 = por %p86_p2, %p85_p1 }
   0x7   :  { %p88_p4 = pnand %p87_p3, %p81_p0 }
   0x9   :  { %91 = shalt.err (!%p88_p4)
}
   0xa   :  { %s94_s13 = smov [#allocation2]  }
   0xb   :  { %17 = dma.vmem_to_smem %s15_s11, 16, %s94_s13, [#allocation3]  }
   0xc   :  { %92 = dma.done.wait [#allocation3], 16  }
   0xd   :  { %93 = vsyncadd [#allocation3], 4294967280 }
   0xe   :  { %23 = sfence }
   0xf   :  { %s27_s14 = sld [smem:[#allocation2]]  ;;  %s71_s15 = sld [smem:[#allocation2 + $0x3]]  ;;  %v24_v0 = vld [vmem:[%s132_s1] sm:$0x1]  ;;  %v25_v1 = vld [vmem:[%s132_s1 + $0x1] sm:$0x1] }
  0x10   :  { %s72_s16 = sld [smem:[#allocation2 + $0x6]]  ;;  %s73_s17 = sld [smem:[#allocation2 + $0x1]]  ;;  %v26_v2 = vld [vmem:[%s132_s1 + $0x2] sm:$0x1] }
  0x11   :  { %s74_s18 = sld [smem:[#allocation2 + $0x4]]  ;;  %s75_s19 = sld [smem:[#allocation2 + $0x7]] }
  0x12   :  { %s76_s0 = sld [smem:[#allocation2 + $0x2]]  ;;  %s77_s20 = sld [smem:[#allocation2 + $0x5]] }
  0x13   :  { %s78_s25 = sld [smem:[#allocation2 + $0x8]] }
  0x15   :  { %v28_v3 = vstv %s27_s14  ;;  %v31_v4 = vstv %s71_s15 }
  0x16   :  { %v29_v5 = vmul.f32 %v28_v3, %v24_v0  ;;  %v32_v6 = vmul.f32 %v31_v4, %v25_v1  ;;  %v35_v7 = vstv %s72_s16  ;;  %v41_v8 = vstv %s73_s17 }
  0x17   :  { %v36_v9 = vmul.f32 %v35_v7, %v26_v2  ;;  %v42_v10 = vmul.f32 %v41_v8, %v24_v0  ;;  %v44_v11 = vstv %s74_s18  ;;  %v48_v12 = vstv %s75_s19 }
  0x18   :  { %v33_v13 = vadd.f32 %v32_v6, %v29_v5  ;;  %v45_v14 = vmul.f32 %v44_v11, %v25_v1  ;;  %v49_v15 = vmul.f32 %v48_v12, %v26_v2  ;;  %v54_v16 = vstv %s76_s0 }
  0x19   :  { %v55_v17 = vmul.f32 %v54_v16, %v24_v0  ;;  %v57_v18 = vstv %s77_s20  ;;  %v61_v19 = vstv %s78_s25 }
  0x1a   :  { %v37_v20 = vadd.f32 %v36_v9, %v33_v13  ;;  %v46_v21 = vadd.f32 %v45_v14, %v42_v10  ;;  %v58_v22 = vmul.f32 %v57_v18, %v25_v1  ;;  %v62_v23 = vmul.f32 %v61_v19, %v26_v2 }
  0x1c   :  { %v38_v24 = vsub.f32 0.0, %v37_v20  ;;  %v50_v25 = vadd.f32 %v49_v15, %v46_v21  ;;  %v59_v26 = vadd.f32 %v58_v22, %v55_v17 }
  0x1e   :  { %39 = vst [vmem:[%s133_s2] sm:$0x1] %v38_v24  ;;  %v51_v27 = vsub.f32 0.0, %v50_v25  ;;  %v63_v28 = vadd.f32 %v62_v23, %v59_v26 }
  0x20   :  { %52 = vst [vmem:[%s133_s2 + $0x1] sm:$0x1] %v51_v27  ;;  %v64_v29 = vsub.f32 0.0, %v63_v28 }
  0x22   :  { %65 = vst [vmem:[%s133_s2 + $0x2] sm:$0x1] %v64_v29 }
  0x23   :  { %70 = vsyncpa [#allocation3], 1 }

</bundles_post_ra>
